<compile_context>
chip_gen: v7x
topology: tpu7x:2x2x1
jax: 0.10.0
libtpu: 0.0.40
codegen_flags: <defaults>
</compile_context>

<pallas_src>
import math
import functools

import jax
import jax.numpy as jnp
from jax.experimental import pallas as pl
from jax.experimental.pallas import tpu as pltpu

# ---------------- config (small, consistent with the module) ----------------
B = 2          # batch
S = 8          # sequence length
D = 32         # hidden_size
H = 4          # num_attention_heads
DH = D // H    # attention_head_size
ADD_ABS_POS_EMB = True
LN_EPS = 1e-12
MASK_NEG = -1e9          # finite "minus infinity" (robust masked_fill)


# ------------------------------ Pallas kernel -------------------------------
def _bert_selfatt_kernel(
    x_ref,       # (B*S, D)   all batch elements, flattened rows
    mask_ref,    # (B, S)     0/1 attention mask
    wq_ref, bq_ref,           # (D, D), (1, D)
    wk_ref, bk_ref,           # (D, D), (1, D)
    wv_ref, bv_ref,           # (D, D), (1, D)
    pos_ref,                  # (S, DH)  abs positional embedding (first S rows)
    posbias_ref,              # (S, S)   (pos @ pos.T) / sqrt(DH), precomputed
    wo_ref, bo_ref,           # (D, D), (1, D)
    gamma_ref, beta_ref,      # (1, D), (1, D)
    out_ref,                  # (B*S, D)
):
    x = x_ref[...]                                             # (BS, D) f32
    inv_scale = 1.0 / math.sqrt(DH)

    # --- QKV projections (MXU); scale folded into Q once ---
    q = (jnp.dot(x, wq_ref[...], preferred_element_type=jnp.float32)
         + bq_ref[...]) * inv_scale                            # (BS, D)
    k = jnp.dot(x, wk_ref[...], preferred_element_type=jnp.float32) + bk_ref[...]
    v = jnp.dot(x, wv_ref[...], preferred_element_type=jnp.float32) + bv_ref[...]

    # --- additive bias shared by all heads: mask + positional constant ---
    mask_bias = jnp.where(mask_ref[...] < 0.5, MASK_NEG, 0.0)  # (B, S)
    add_bias = posbias_ref[...][None, :, :] + mask_bias[:, None, :]  # (B, S, S)

    pos = pos_ref[...]                                         # (S, DH)

    # --- per-head attention, batched over B; accumulate through Wo ---
    hidden = jnp.zeros((B * S, D), jnp.float32)
    for h in range(H):                                         # H=4, static
        sl = slice(h * DH, (h + 1) * DH)
        qh = q[:, sl].reshape(B, S, DH)                        # (B, S, DH)
        kh = k[:, sl].reshape(B, S, DH) + pos[None]            # pos folded in
        vh = v[:, sl].reshape(B, S, DH)

        scores = jnp.einsum("bqd,bkd->bqk", qh, kh,
                            preferred_element_type=jnp.float32)  # (B, S, S)
        scores = scores + add_bias

        m = jnp.max(scores, axis=-1, keepdims=True)
        e = jnp.exp(scores - m)
        denom = jnp.sum(e, axis=-1, keepdims=True)
        probs = e * pl.reciprocal(denom, approx=False)         # one recip/row
        # NOTE: attention dropout is identity in eval mode.

        ctx = jnp.einsum("bqk,bkd->bqd", probs, vh,
                         preferred_element_type=jnp.float32)   # (B, S, DH)
        # accumulate output projection per head: no concat along lanes
        hidden = hidden + jnp.dot(ctx.reshape(B * S, DH), wo_ref[sl, :],
                                  preferred_element_type=jnp.float32)

    hidden = hidden + bo_ref[...]
    # NOTE: hidden dropout is identity in eval mode.
    res = hidden + x                                           # residual

    # --- LayerNorm ---
    mean = jnp.mean(res, axis=-1, keepdims=True)
    var = jnp.mean((res - mean) ** 2, axis=-1, keepdims=True)
    y = (res - mean) * jax.lax.rsqrt(var + LN_EPS)
    y = y * gamma_ref[...] + beta_ref[...]

    out_ref[...] = y.astype(out_ref.dtype)


# ------------------------------ host wrapper ---------------------------------
@functools.partial(jax.jit, static_argnames=())
def bert_selfatt_layer(x, mask, params):
    """x: (B, S, D) float32; mask: (B, S) float32 of 0/1."""
    x2 = x.reshape(B * S, D)                                   # free host reshape
    # constant positional score term, already scaled by 1/sqrt(DH)
    pos_bias = jnp.dot(params["pos"], params["pos"].T) * (1.0 / math.sqrt(DH))

    def full(shape):
        return pl.BlockSpec(shape, lambda i, _s=shape: (0,) * len(_s))

    in_specs = [
        full((B * S, D)),                 # x
        full((B, S)),                     # mask
        full((D, D)), full((1, D)),       # Wq, bq
        full((D, D)), full((1, D)),       # Wk, bk
        full((D, D)), full((1, D)),       # Wv, bv
        full((S, DH)),                    # pos_emb (first S rows)
        full((S, S)),                     # pos @ pos.T / sqrt(DH)
        full((D, D)), full((1, D)),       # Wo, bo
        full((1, D)), full((1, D)),       # gamma, beta
    ]

    out = pl.pallas_call(
        _bert_selfatt_kernel,
        out_shape=jax.ShapeDtypeStruct((B * S, D), x.dtype),
        grid=(1,),                                           # single step
        in_specs=in_specs,
        out_specs=full((B * S, D)),
        compiler_params=pltpu.CompilerParams(
            dimension_semantics=("arbitrary",)),
    )(
        x2, mask,
        params["wq"], params["bq"],
        params["wk"], params["bk"],
        params["wv"], params["bv"],
        params["pos"], pos_bias,
        params["wo"], params["bo"],
        params["gamma"], params["beta"],
    )
    return out.reshape(B, S, D)


# --------------------------- pure-JAX reference ------------------------------
def reference(x, mask, params):
    q = x @ params["wq"] + params["bq"][0]
    k = x @ params["wk"] + params["bk"][0]
    v = x @ params["wv"] + params["bv"][0]

    def split(t):  # (B,S,D) -> (B,H,S,DH)
        return t.reshape(B, S, H, DH).transpose(0, 2, 1, 3)

    qh, kh, vh = split(q), split(k), split(v)
    scores = jnp.einsum("bhqd,bhkd->bhqk", qh, kh)
    if ADD_ABS_POS_EMB:
        pos = params["pos"]                                   # (S, DH)
        pos_scores = jnp.einsum("bhqd,kd->bhqk", qh + pos[None, None], pos)
        scores = scores + pos_scores
    scores = scores / math.sqrt(DH)
    bias = jnp.where(mask == 0.0, -jnp.inf, 0.0)[:, None, None, :]
    scores = scores + bias
    probs = jax.nn.softmax(scores, axis=-1)
    ctx = jnp.einsum("bhqk,bhkd->bhqd", probs, vh)
    ctx = ctx.transpose(0, 2, 1, 3).reshape(B, S, D)
    hidden = ctx @ params["wo"] + params["bo"][0]
    res = hidden + x
    mean = jnp.mean(res, axis=-1, keepdims=True)
    var = jnp.mean((res - mean) ** 2, axis=-1, keepdims=True)
    return (res - mean) / jnp.sqrt(var + LN_EPS) * params["gamma"][0] + params["beta"][0]


# ----------------------------------- main ------------------------------------
if __name__ == "__main__":
    key = jax.random.PRNGKey(0)
    keys = jax.random.split(key, 10)

    init = lambda k, shape, scale=0.05: (scale * jax.random.normal(k, shape)).astype(jnp.float32)

    params = {
        "wq": init(keys[0], (D, D)), "bq": init(keys[1], (1, D)),
        "wk": init(keys[2], (D, D)), "bk": init(keys[3], (1, D)),
        "wv": init(keys[4], (D, D)), "bv": init(keys[5], (1, D)),
        # module stores abs_pos_emb of shape (512, DH); only the first S rows
        # are used in the forward pass, so we materialize just that slice.
        "pos": init(keys[6], (S, DH), scale=0.1),
        "wo": init(keys[7], (D, D)), "bo": init(keys[8], (1, D)),
        "gamma": jnp.ones((1, D), jnp.float32),
        "beta": jnp.zeros((1, D), jnp.float32),
    }

    x = jax.random.normal(keys[9], (B, S, D), dtype=jnp.float32)
    # attention mask: 0/1, last two key positions of batch 1 masked out
    mask = jnp.ones((B, S), jnp.float32).at[1, -2:].set(0.0)

    out = bert_selfatt_layer(x, mask, params)
    out = jax.block_until_ready(out)

    ref = reference(x, mask, params)
    assert out.shape == (B, S, D)
    assert jnp.allclose(out, ref, atol=1e-4, rtol=1e-4), "mismatch vs reference"

    print("KERNEL_OK")
</pallas_src>

<mosaic_0001>
module attributes {stable_mosaic.version = 11 : i64} {
  func.func @_bert_selfatt_kernel(%arg0: i32, %arg1: memref<16x32xf32, #tpu.memory_space<vmem>>, %arg2: memref<2x8xf32, #tpu.memory_space<vmem>>, %arg3: memref<32x32xf32, #tpu.memory_space<vmem>>, %arg4: memref<1x32xf32, #tpu.memory_space<vmem>>, %arg5: memref<32x32xf32, #tpu.memory_space<vmem>>, %arg6: memref<1x32xf32, #tpu.memory_space<vmem>>, %arg7: memref<32x32xf32, #tpu.memory_space<vmem>>, %arg8: memref<1x32xf32, #tpu.memory_space<vmem>>, %arg9: memref<8x8xf32, #tpu.memory_space<vmem>>, %arg10: memref<8x8xf32, #tpu.memory_space<vmem>>, %arg11: memref<32x32xf32, #tpu.memory_space<vmem>>, %arg12: memref<1x32xf32, #tpu.memory_space<vmem>>, %arg13: memref<1x32xf32, #tpu.memory_space<vmem>>, %arg14: memref<1x32xf32, #tpu.memory_space<vmem>>, %arg15: memref<16x32xf32, #tpu.memory_space<vmem>>) attributes {dimension_semantics = [#tpu.dimension_semantics<arbitrary>], iteration_bounds = array<i64: 1>, scalar_prefetch = 0 : i64, scratch_operands = 0 : i64, tpu.core_type = #tpu.core_type<tc>, window_params = [{pipeline_mode = #tpu.pipeline_mode<synchronous>, transform_indices = @transform_0, window_bounds = array<i64: 16, 32>}, {pipeline_mode = #tpu.pipeline_mode<synchronous>, transform_indices = @transform_1, window_bounds = array<i64: 2, 8>}, {pipeline_mode = #tpu.pipeline_mode<synchronous>, transform_indices = @transform_2, window_bounds = array<i64: 32, 32>}, {pipeline_mode = #tpu.pipeline_mode<synchronous>, transform_indices = @transform_3, window_bounds = array<i64: 1, 32>}, {pipeline_mode = #tpu.pipeline_mode<synchronous>, transform_indices = @transform_4, window_bounds = array<i64: 32, 32>}, {pipeline_mode = #tpu.pipeline_mode<synchronous>, transform_indices = @transform_5, window_bounds = array<i64: 1, 32>}, {pipeline_mode = #tpu.pipeline_mode<synchronous>, transform_indices = @transform_6, window_bounds = array<i64: 32, 32>}, {pipeline_mode = #tpu.pipeline_mode<synchronous>, transform_indices = @transform_7, window_bounds = array<i64: 1, 32>}, {pipeline_mode = #tpu.pipeline_mode<synchronous>, transform_indices = @transform_8, window_bounds = array<i64: 8, 8>}, {pipeline_mode = #tpu.pipeline_mode<synchronous>, transform_indices = @transform_9, window_bounds = array<i64: 8, 8>}, {pipeline_mode = #tpu.pipeline_mode<synchronous>, transform_indices = @transform_10, window_bounds = array<i64: 32, 32>}, {pipeline_mode = #tpu.pipeline_mode<synchronous>, transform_indices = @transform_11, window_bounds = array<i64: 1, 32>}, {pipeline_mode = #tpu.pipeline_mode<synchronous>, transform_indices = @transform_12, window_bounds = array<i64: 1, 32>}, {pipeline_mode = #tpu.pipeline_mode<synchronous>, transform_indices = @transform_13, window_bounds = array<i64: 1, 32>}, {pipeline_mode = #tpu.pipeline_mode<synchronous>, transform_indices = @transform_14, window_bounds = array<i64: 16, 32>}]} {
    %c0 = arith.constant 0 : index
    %c0_0 = arith.constant 0 : index
    %0 = vector.load %arg1[%c0, %c0_0] : memref<16x32xf32, #tpu.memory_space<vmem>>, vector<16x32xf32>
    %c0_1 = arith.constant 0 : index
    %c0_2 = arith.constant 0 : index
    %1 = vector.load %arg3[%c0_1, %c0_2] : memref<32x32xf32, #tpu.memory_space<vmem>>, vector<32x32xf32>
    %cst = arith.constant dense<0.000000e+00> : vector<16x32xf32>
    %2 = tpu.matmul %0, %1, %cst {dimension_numbers = #tpu.dot_dimension_numbers<[1], [0], [0], [1], [0, 0, 1, 1], [], []>} : vector<16x32xf32>, vector<32x32xf32>, vector<16x32xf32> -> vector<16x32xf32>
    %c0_3 = arith.constant 0 : index
    %c0_4 = arith.constant 0 : index
    %3 = vector.load %arg4[%c0_3, %c0_4] : memref<1x32xf32, #tpu.memory_space<vmem>>, vector<1x32xf32>
    %4 = vector.broadcast %3 : vector<1x32xf32> to vector<16x32xf32>
    %5 = arith.addf %2, %4 : vector<16x32xf32>
    %cst_5 = arith.constant 0.353553385 : f32
    %6 = vector.broadcast %cst_5 : f32 to vector<16x32xf32>
    %7 = arith.mulf %5, %6 : vector<16x32xf32>
    %c0_6 = arith.constant 0 : index
    %c0_7 = arith.constant 0 : index
    %8 = vector.load %arg5[%c0_6, %c0_7] : memref<32x32xf32, #tpu.memory_space<vmem>>, vector<32x32xf32>
    %cst_8 = arith.constant dense<0.000000e+00> : vector<16x32xf32>
    %9 = tpu.matmul %0, %8, %cst_8 {dimension_numbers = #tpu.dot_dimension_numbers<[1], [0], [0], [1], [0, 0, 1, 1], [], []>} : vector<16x32xf32>, vector<32x32xf32>, vector<16x32xf32> -> vector<16x32xf32>
    %c0_9 = arith.constant 0 : index
    %c0_10 = arith.constant 0 : index
    %10 = vector.load %arg6[%c0_9, %c0_10] : memref<1x32xf32, #tpu.memory_space<vmem>>, vector<1x32xf32>
    %11 = vector.broadcast %10 : vector<1x32xf32> to vector<16x32xf32>
    %12 = arith.addf %9, %11 : vector<16x32xf32>
    %c0_11 = arith.constant 0 : index
    %c0_12 = arith.constant 0 : index
    %13 = vector.load %arg7[%c0_11, %c0_12] : memref<32x32xf32, #tpu.memory_space<vmem>>, vector<32x32xf32>
    %cst_13 = arith.constant dense<0.000000e+00> : vector<16x32xf32>
    %14 = tpu.matmul %0, %13, %cst_13 {dimension_numbers = #tpu.dot_dimension_numbers<[1], [0], [0], [1], [0, 0, 1, 1], [], []>} : vector<16x32xf32>, vector<32x32xf32>, vector<16x32xf32> -> vector<16x32xf32>
    %c0_14 = arith.constant 0 : index
    %c0_15 = arith.constant 0 : index
    %15 = vector.load %arg8[%c0_14, %c0_15] : memref<1x32xf32, #tpu.memory_space<vmem>>, vector<1x32xf32>
    %16 = vector.broadcast %15 : vector<1x32xf32> to vector<16x32xf32>
    %17 = arith.addf %14, %16 : vector<16x32xf32>
    %c0_16 = arith.constant 0 : index
    %c0_17 = arith.constant 0 : index
    %18 = vector.load %arg2[%c0_16, %c0_17] : memref<2x8xf32, #tpu.memory_space<vmem>>, vector<2x8xf32>
    %cst_18 = arith.constant 5.000000e-01 : f32
    %19 = vector.broadcast %cst_18 : f32 to vector<2x8xf32>
    %20 = arith.cmpf olt, %18, %19 : vector<2x8xf32>
    %cst_19 = arith.constant -1.000000e+09 : f32
    %cst_20 = arith.constant 0.000000e+00 : f32
    %21 = vector.broadcast %cst_19 : f32 to vector<2x8xf32>
    %22 = vector.broadcast %cst_20 : f32 to vector<2x8xf32>
    %23 = arith.select %20, %21, %22 : vector<2x8xi1>, vector<2x8xf32>
    %c0_21 = arith.constant 0 : index
    %c0_22 = arith.constant 0 : index
    %24 = vector.load %arg10[%c0_21, %c0_22] : memref<8x8xf32, #tpu.memory_space<vmem>>, vector<8x8xf32>
    %25 = vector.shape_cast %24 : vector<8x8xf32> to vector<1x8x8xf32>
    %26 = vector.shape_cast %23 : vector<2x8xf32> to vector<2x1x8xf32>
    %27 = vector.broadcast %25 : vector<1x8x8xf32> to vector<2x8x8xf32>
    %28 = vector.broadcast %26 : vector<2x1x8xf32> to vector<2x8x8xf32>
    %29 = arith.addf %27, %28 : vector<2x8x8xf32>
    %c0_23 = arith.constant 0 : index
    %c0_24 = arith.constant 0 : index
    %30 = vector.load %arg9[%c0_23, %c0_24] : memref<8x8xf32, #tpu.memory_space<vmem>>, vector<8x8xf32>
    %cst_25 = arith.constant 0.000000e+00 : f32
    %31 = vector.broadcast %cst_25 : f32 to vector<16x32xf32>
    %32 = vector.extract_strided_slice %7 {offsets = [0, 0], sizes = [16, 8], strides = [1, 1]} : vector<16x32xf32> to vector<16x8xf32>
    %33 = vector.shape_cast %32 : vector<16x8xf32> to vector<2x8x8xf32>
    %34 = vector.extract_strided_slice %12 {offsets = [0, 0], sizes = [16, 8], strides = [1, 1]} : vector<16x32xf32> to vector<16x8xf32>
    %35 = vector.shape_cast %34 : vector<16x8xf32> to vector<2x8x8xf32>
    %36 = vector.shape_cast %30 : vector<8x8xf32> to vector<1x8x8xf32>
    %37 = vector.broadcast %36 : vector<1x8x8xf32> to vector<2x8x8xf32>
    %38 = arith.addf %35, %37 : vector<2x8x8xf32>
    %39 = vector.extract_strided_slice %17 {offsets = [0, 0], sizes = [16, 8], strides = [1, 1]} : vector<16x32xf32> to vector<16x8xf32>
    %40 = vector.shape_cast %39 : vector<16x8xf32> to vector<2x8x8xf32>
    "tpu.trace_start"() <{level = 10 : i32, message = "bqd,bkd->bqk"}> : () -> ()
    %cst_26 = arith.constant dense<0.000000e+00> : vector<2x8x8xf32>
    %41 = tpu.matmul %33, %38, %cst_26 {dimension_numbers = #tpu.dot_dimension_numbers<[2], [2], [1], [1], [0, 0, 0, 1, 1, 1], [0], [0]>} : vector<2x8x8xf32>, vector<2x8x8xf32>, vector<2x8x8xf32> -> vector<2x8x8xf32>
    "tpu.trace_stop"() : () -> ()
    %42 = arith.addf %41, %29 : vector<2x8x8xf32>
    %cst_27 = arith.constant dense<0xFF800000> : vector<2x8xf32>
    %43 = vector.multi_reduction <maximumf>, %42, %cst_27 [2] : vector<2x8x8xf32> to vector<2x8xf32>
    %44 = vector.shape_cast %43 : vector<2x8xf32> to vector<2x8x1xf32>
    %45 = vector.broadcast %44 : vector<2x8x1xf32> to vector<2x8x8xf32>
    %46 = arith.subf %42, %45 : vector<2x8x8xf32>
    %47 = math.exp %46 : vector<2x8x8xf32>
    %cst_28 = arith.constant dense<0.000000e+00> : vector<2x8xf32>
    %48 = vector.multi_reduction <add>, %47, %cst_28 [2] : vector<2x8x8xf32> to vector<2x8xf32>
    %49 = vector.shape_cast %48 : vector<2x8xf32> to vector<2x8x1xf32>
    %50 = tpu.reciprocal %49 : vector<2x8x1xf32> -> vector<2x8x1xf32>
    %51 = vector.broadcast %50 : vector<2x8x1xf32> to vector<2x8x8xf32>
    %52 = arith.mulf %47, %51 : vector<2x8x8xf32>
    "tpu.trace_start"() <{level = 10 : i32, message = "bqk,bkd->bqd"}> : () -> ()
    %cst_29 = arith.constant dense<0.000000e+00> : vector<2x8x8xf32>
    %53 = tpu.matmul %52, %40, %cst_29 {dimension_numbers = #tpu.dot_dimension_numbers<[2], [1], [1], [2], [0, 0, 0, 1, 1, 2], [0], [0]>} : vector<2x8x8xf32>, vector<2x8x8xf32>, vector<2x8x8xf32> -> vector<2x8x8xf32>
    "tpu.trace_stop"() : () -> ()
    %54 = vector.shape_cast %53 : vector<2x8x8xf32> to vector<16x8xf32>
    %c0_30 = arith.constant 0 : index
    %c0_31 = arith.constant 0 : index
    %55 = vector.load %arg11[%c0_30, %c0_31] : memref<32x32xf32, #tpu.memory_space<vmem>>, vector<8x32xf32>
    %cst_32 = arith.constant dense<0.000000e+00> : vector<16x32xf32>
    %56 = tpu.matmul %54, %55, %cst_32 {dimension_numbers = #tpu.dot_dimension_numbers<[1], [0], [0], [1], [0, 0, 1, 1], [], []>} : vector<16x8xf32>, vector<8x32xf32>, vector<16x32xf32> -> vector<16x32xf32>
    %57 = arith.addf %31, %56 : vector<16x32xf32>
    %58 = vector.extract_strided_slice %7 {offsets = [0, 8], sizes = [16, 8], strides = [1, 1]} : vector<16x32xf32> to vector<16x8xf32>
    %59 = vector.shape_cast %58 : vector<16x8xf32> to vector<2x8x8xf32>
    %60 = vector.extract_strided_slice %12 {offsets = [0, 8], sizes = [16, 8], strides = [1, 1]} : vector<16x32xf32> to vector<16x8xf32>
    %61 = vector.shape_cast %60 : vector<16x8xf32> to vector<2x8x8xf32>
    %62 = vector.shape_cast %30 : vector<8x8xf32> to vector<1x8x8xf32>
    %63 = vector.broadcast %62 : vector<1x8x8xf32> to vector<2x8x8xf32>
    %64 = arith.addf %61, %63 : vector<2x8x8xf32>
    %65 = vector.extract_strided_slice %17 {offsets = [0, 8], sizes = [16, 8], strides = [1, 1]} : vector<16x32xf32> to vector<16x8xf32>
    %66 = vector.shape_cast %65 : vector<16x8xf32> to vector<2x8x8xf32>
    "tpu.trace_start"() <{level = 10 : i32, message = "bqd,bkd->bqk"}> : () -> ()
    %cst_33 = arith.constant dense<0.000000e+00> : vector<2x8x8xf32>
    %67 = tpu.matmul %59, %64, %cst_33 {dimension_numbers = #tpu.dot_dimension_numbers<[2], [2], [1], [1], [0, 0, 0, 1, 1, 1], [0], [0]>} : vector<2x8x8xf32>, vector<2x8x8xf32>, vector<2x8x8xf32> -> vector<2x8x8xf32>
    "tpu.trace_stop"() : () -> ()
    %68 = arith.addf %67, %29 : vector<2x8x8xf32>
    %cst_34 = arith.constant dense<0xFF800000> : vector<2x8xf32>
    %69 = vector.multi_reduction <maximumf>, %68, %cst_34 [2] : vector<2x8x8xf32> to vector<2x8xf32>
    %70 = vector.shape_cast %69 : vector<2x8xf32> to vector<2x8x1xf32>
    %71 = vector.broadcast %70 : vector<2x8x1xf32> to vector<2x8x8xf32>
    %72 = arith.subf %68, %71 : vector<2x8x8xf32>
    %73 = math.exp %72 : vector<2x8x8xf32>
    %cst_35 = arith.constant dense<0.000000e+00> : vector<2x8xf32>
    %74 = vector.multi_reduction <add>, %73, %cst_35 [2] : vector<2x8x8xf32> to vector<2x8xf32>
    %75 = vector.shape_cast %74 : vector<2x8xf32> to vector<2x8x1xf32>
    %76 = tpu.reciprocal %75 : vector<2x8x1xf32> -> vector<2x8x1xf32>
    %77 = vector.broadcast %76 : vector<2x8x1xf32> to vector<2x8x8xf32>
    %78 = arith.mulf %73, %77 : vector<2x8x8xf32>
    "tpu.trace_start"() <{level = 10 : i32, message = "bqk,bkd->bqd"}> : () -> ()
    %cst_36 = arith.constant dense<0.000000e+00> : vector<2x8x8xf32>
    %79 = tpu.matmul %78, %66, %cst_36 {dimension_numbers = #tpu.dot_dimension_numbers<[2], [1], [1], [2], [0, 0, 0, 1, 1, 2], [0], [0]>} : vector<2x8x8xf32>, vector<2x8x8xf32>, vector<2x8x8xf32> -> vector<2x8x8xf32>
    "tpu.trace_stop"() : () -> ()
    %80 = vector.shape_cast %79 : vector<2x8x8xf32> to vector<16x8xf32>
    %c8 = arith.constant 8 : index
    %c0_37 = arith.constant 0 : index
    %81 = vector.load %arg11[%c8, %c0_37] : memref<32x32xf32, #tpu.memory_space<vmem>>, vector<8x32xf32>
    %cst_38 = arith.constant dense<0.000000e+00> : vector<16x32xf32>
    %82 = tpu.matmul %80, %81, %cst_38 {dimension_numbers = #tpu.dot_dimension_numbers<[1], [0], [0], [1], [0, 0, 1, 1], [], []>} : vector<16x8xf32>, vector<8x32xf32>, vector<16x32xf32> -> vector<16x32xf32>
    %83 = arith.addf %57, %82 : vector<16x32xf32>
    %84 = vector.extract_strided_slice %7 {offsets = [0, 16], sizes = [16, 8], strides = [1, 1]} : vector<16x32xf32> to vector<16x8xf32>
    %85 = vector.shape_cast %84 : vector<16x8xf32> to vector<2x8x8xf32>
    %86 = vector.extract_strided_slice %12 {offsets = [0, 16], sizes = [16, 8], strides = [1, 1]} : vector<16x32xf32> to vector<16x8xf32>
    %87 = vector.shape_cast %86 : vector<16x8xf32> to vector<2x8x8xf32>
    %88 = vector.shape_cast %30 : vector<8x8xf32> to vector<1x8x8xf32>
    %89 = vector.broadcast %88 : vector<1x8x8xf32> to vector<2x8x8xf32>
    %90 = arith.addf %87, %89 : vector<2x8x8xf32>
    %91 = vector.extract_strided_slice %17 {offsets = [0, 16], sizes = [16, 8], strides = [1, 1]} : vector<16x32xf32> to vector<16x8xf32>
    %92 = vector.shape_cast %91 : vector<16x8xf32> to vector<2x8x8xf32>
    "tpu.trace_start"() <{level = 10 : i32, message = "bqd,bkd->bqk"}> : () -> ()
    %cst_39 = arith.constant dense<0.000000e+00> : vector<2x8x8xf32>
    %93 = tpu.matmul %85, %90, %cst_39 {dimension_numbers = #tpu.dot_dimension_numbers<[2], [2], [1], [1], [0, 0, 0, 1, 1, 1], [0], [0]>} : vector<2x8x8xf32>, vector<2x8x8xf32>, vector<2x8x8xf32> -> vector<2x8x8xf32>
    "tpu.trace_stop"() : () -> ()
    %94 = arith.addf %93, %29 : vector<2x8x8xf32>
    %cst_40 = arith.constant dense<0xFF800000> : vector<2x8xf32>
    %95 = vector.multi_reduction <maximumf>, %94, %cst_40 [2] : vector<2x8x8xf32> to vector<2x8xf32>
    %96 = vector.shape_cast %95 : vector<2x8xf32> to vector<2x8x1xf32>
    %97 = vector.broadcast %96 : vector<2x8x1xf32> to vector<2x8x8xf32>
    %98 = arith.subf %94, %97 : vector<2x8x8xf32>
    %99 = math.exp %98 : vector<2x8x8xf32>
    %cst_41 = arith.constant dense<0.000000e+00> : vector<2x8xf32>
    %100 = vector.multi_reduction <add>, %99, %cst_41 [2] : vector<2x8x8xf32> to vector<2x8xf32>
    %101 = vector.shape_cast %100 : vector<2x8xf32> to vector<2x8x1xf32>
    %102 = tpu.reciprocal %101 : vector<2x8x1xf32> -> vector<2x8x1xf32>
    %103 = vector.broadcast %102 : vector<2x8x1xf32> to vector<2x8x8xf32>
    %104 = arith.mulf %99, %103 : vector<2x8x8xf32>
    "tpu.trace_start"() <{level = 10 : i32, message = "bqk,bkd->bqd"}> : () -> ()
    %cst_42 = arith.constant dense<0.000000e+00> : vector<2x8x8xf32>
    %105 = tpu.matmul %104, %92, %cst_42 {dimension_numbers = #tpu.dot_dimension_numbers<[2], [1], [1], [2], [0, 0, 0, 1, 1, 2], [0], [0]>} : vector<2x8x8xf32>, vector<2x8x8xf32>, vector<2x8x8xf32> -> vector<2x8x8xf32>
    "tpu.trace_stop"() : () -> ()
    %106 = vector.shape_cast %105 : vector<2x8x8xf32> to vector<16x8xf32>
    %c16 = arith.constant 16 : index
    %c0_43 = arith.constant 0 : index
    %107 = vector.load %arg11[%c16, %c0_43] : memref<32x32xf32, #tpu.memory_space<vmem>>, vector<8x32xf32>
    %cst_44 = arith.constant dense<0.000000e+00> : vector<16x32xf32>
    %108 = tpu.matmul %106, %107, %cst_44 {dimension_numbers = #tpu.dot_dimension_numbers<[1], [0], [0], [1], [0, 0, 1, 1], [], []>} : vector<16x8xf32>, vector<8x32xf32>, vector<16x32xf32> -> vector<16x32xf32>
    %109 = arith.addf %83, %108 : vector<16x32xf32>
    %110 = vector.extract_strided_slice %7 {offsets = [0, 24], sizes = [16, 8], strides = [1, 1]} : vector<16x32xf32> to vector<16x8xf32>
    %111 = vector.shape_cast %110 : vector<16x8xf32> to vector<2x8x8xf32>
    %112 = vector.extract_strided_slice %12 {offsets = [0, 24], sizes = [16, 8], strides = [1, 1]} : vector<16x32xf32> to vector<16x8xf32>
    %113 = vector.shape_cast %112 : vector<16x8xf32> to vector<2x8x8xf32>
    %114 = vector.shape_cast %30 : vector<8x8xf32> to vector<1x8x8xf32>
    %115 = vector.broadcast %114 : vector<1x8x8xf32> to vector<2x8x8xf32>
    %116 = arith.addf %113, %115 : vector<2x8x8xf32>
    %117 = vector.extract_strided_slice %17 {offsets = [0, 24], sizes = [16, 8], strides = [1, 1]} : vector<16x32xf32> to vector<16x8xf32>
    %118 = vector.shape_cast %117 : vector<16x8xf32> to vector<2x8x8xf32>
    "tpu.trace_start"() <{level = 10 : i32, message = "bqd,bkd->bqk"}> : () -> ()
    %cst_45 = arith.constant dense<0.000000e+00> : vector<2x8x8xf32>
    %119 = tpu.matmul %111, %116, %cst_45 {dimension_numbers = #tpu.dot_dimension_numbers<[2], [2], [1], [1], [0, 0, 0, 1, 1, 1], [0], [0]>} : vector<2x8x8xf32>, vector<2x8x8xf32>, vector<2x8x8xf32> -> vector<2x8x8xf32>
    "tpu.trace_stop"() : () -> ()
    %120 = arith.addf %119, %29 : vector<2x8x8xf32>
    %cst_46 = arith.constant dense<0xFF800000> : vector<2x8xf32>
    %121 = vector.multi_reduction <maximumf>, %120, %cst_46 [2] : vector<2x8x8xf32> to vector<2x8xf32>
    %122 = vector.shape_cast %121 : vector<2x8xf32> to vector<2x8x1xf32>
    %123 = vector.broadcast %122 : vector<2x8x1xf32> to vector<2x8x8xf32>
    %124 = arith.subf %120, %123 : vector<2x8x8xf32>
    %125 = math.exp %124 : vector<2x8x8xf32>
    %cst_47 = arith.constant dense<0.000000e+00> : vector<2x8xf32>
    %126 = vector.multi_reduction <add>, %125, %cst_47 [2] : vector<2x8x8xf32> to vector<2x8xf32>
    %127 = vector.shape_cast %126 : vector<2x8xf32> to vector<2x8x1xf32>
    %128 = tpu.reciprocal %127 : vector<2x8x1xf32> -> vector<2x8x1xf32>
    %129 = vector.broadcast %128 : vector<2x8x1xf32> to vector<2x8x8xf32>
    %130 = arith.mulf %125, %129 : vector<2x8x8xf32>
    "tpu.trace_start"() <{level = 10 : i32, message = "bqk,bkd->bqd"}> : () -> ()
    %cst_48 = arith.constant dense<0.000000e+00> : vector<2x8x8xf32>
    %131 = tpu.matmul %130, %118, %cst_48 {dimension_numbers = #tpu.dot_dimension_numbers<[2], [1], [1], [2], [0, 0, 0, 1, 1, 2], [0], [0]>} : vector<2x8x8xf32>, vector<2x8x8xf32>, vector<2x8x8xf32> -> vector<2x8x8xf32>
    "tpu.trace_stop"() : () -> ()
    %132 = vector.shape_cast %131 : vector<2x8x8xf32> to vector<16x8xf32>
    %c24 = arith.constant 24 : index
    %c0_49 = arith.constant 0 : index
    %133 = vector.load %arg11[%c24, %c0_49] : memref<32x32xf32, #tpu.memory_space<vmem>>, vector<8x32xf32>
    %cst_50 = arith.constant dense<0.000000e+00> : vector<16x32xf32>
    %134 = tpu.matmul %132, %133, %cst_50 {dimension_numbers = #tpu.dot_dimension_numbers<[1], [0], [0], [1], [0, 0, 1, 1], [], []>} : vector<16x8xf32>, vector<8x32xf32>, vector<16x32xf32> -> vector<16x32xf32>
    %135 = arith.addf %109, %134 : vector<16x32xf32>
    %c0_51 = arith.constant 0 : index
    %c0_52 = arith.constant 0 : index
    %136 = vector.load %arg12[%c0_51, %c0_52] : memref<1x32xf32, #tpu.memory_space<vmem>>, vector<1x32xf32>
    %137 = vector.broadcast %136 : vector<1x32xf32> to vector<16x32xf32>
    %138 = arith.addf %135, %137 : vector<16x32xf32>
    %139 = arith.addf %138, %0 : vector<16x32xf32>
    %cst_53 = arith.constant dense<0.000000e+00> : vector<16xf32>
    %140 = vector.multi_reduction <add>, %139, %cst_53 [1] : vector<16x32xf32> to vector<16xf32>
    %141 = vector.shape_cast %140 : vector<16xf32> to vector<16x1xf32>
    %cst_54 = arith.constant 3.200000e+01 : f32
    %142 = vector.broadcast %cst_54 : f32 to vector<16x1xf32>
    %143 = arith.divf %141, %142 : vector<16x1xf32>
    %144 = vector.broadcast %143 : vector<16x1xf32> to vector<16x32xf32>
    %145 = arith.subf %139, %144 : vector<16x32xf32>
    %146 = arith.mulf %145, %145 : vector<16x32xf32>
    %cst_55 = arith.constant dense<0.000000e+00> : vector<16xf32>
    %147 = vector.multi_reduction <add>, %146, %cst_55 [1] : vector<16x32xf32> to vector<16xf32>
    %148 = vector.shape_cast %147 : vector<16xf32> to vector<16x1xf32>
    %cst_56 = arith.constant 3.200000e+01 : f32
    %149 = vector.broadcast %cst_56 : f32 to vector<16x1xf32>
    %150 = arith.divf %148, %149 : vector<16x1xf32>
    %151 = vector.broadcast %143 : vector<16x1xf32> to vector<16x32xf32>
    %152 = arith.subf %139, %151 : vector<16x32xf32>
    %cst_57 = arith.constant 9.99999996E-13 : f32
    %153 = vector.broadcast %cst_57 : f32 to vector<16x1xf32>
    %154 = arith.addf %150, %153 : vector<16x1xf32>
    %155 = math.rsqrt %154 : vector<16x1xf32>
    %156 = vector.broadcast %155 : vector<16x1xf32> to vector<16x32xf32>
    %157 = arith.mulf %152, %156 : vector<16x32xf32>
    %c0_58 = arith.constant 0 : index
    %c0_59 = arith.constant 0 : index
    %158 = vector.load %arg13[%c0_58, %c0_59] : memref<1x32xf32, #tpu.memory_space<vmem>>, vector<1x32xf32>
    %159 = vector.broadcast %158 : vector<1x32xf32> to vector<16x32xf32>
    %160 = arith.mulf %157, %159 : vector<16x32xf32>
    %c0_60 = arith.constant 0 : index
    %c0_61 = arith.constant 0 : index
    %161 = vector.load %arg14[%c0_60, %c0_61] : memref<1x32xf32, #tpu.memory_space<vmem>>, vector<1x32xf32>
    %162 = vector.broadcast %161 : vector<1x32xf32> to vector<16x32xf32>
    %163 = arith.addf %160, %162 : vector<16x32xf32>
    %c0_62 = arith.constant 0 : index
    %c0_63 = arith.constant 0 : index
    %164 = vector.load %arg15[%c0_62, %c0_63] : memref<16x32xf32, #tpu.memory_space<vmem>>, vector<16x32xf32>
    tpu.vector_store %arg15[%c0_62, %c0_63], %163 {strides = array<i32>} : memref<16x32xf32, #tpu.memory_space<vmem>>, vector<16x32xf32>,
    return
  }
  func.func @transform_0(%arg0: i32) -> (i32, i32) {
    %c0_i32 = arith.constant 0 : i32
    %c0_i32_0 = arith.constant 0 : i32
    %c0_i32_1 = arith.constant 0 : i32
    return %c0_i32, %c0_i32_0 : i32, i32
  }
  func.func @transform_1(%arg0: i32) -> (i32, i32) {
    %c0_i32 = arith.constant 0 : i32
    %c0_i32_0 = arith.constant 0 : i32
    %c0_i32_1 = arith.constant 0 : i32
    return %c0_i32, %c0_i32_0 : i32, i32
  }
  func.func @transform_2(%arg0: i32) -> (i32, i32) {
    %c0_i32 = arith.constant 0 : i32
    %c0_i32_0 = arith.constant 0 : i32
    %c0_i32_1 = arith.constant 0 : i32
    return %c0_i32, %c0_i32_0 : i32, i32
  }
  func.func @transform_3(%arg0: i32) -> (i32, i32) {
    %c0_i32 = arith.constant 0 : i32
    %c0_i32_0 = arith.constant 0 : i32
    %c0_i32_1 = arith.constant 0 : i32
    return %c0_i32, %c0_i32_0 : i32, i32
  }
  func.func @transform_4(%arg0: i32) -> (i32, i32) {
    %c0_i32 = arith.constant 0 : i32
    %c0_i32_0 = arith.constant 0 : i32
    %c0_i32_1 = arith.constant 0 : i32
    return %c0_i32, %c0_i32_0 : i32, i32
  }
  func.func @transform_5(%arg0: i32) -> (i32, i32) {
    %c0_i32 = arith.constant 0 : i32
    %c0_i32_0 = arith.constant 0 : i32
    %c0_i32_1 = arith.constant 0 : i32
    return %c0_i32, %c0_i32_0 : i32, i32
  }
  func.func @transform_6(%arg0: i32) -> (i32, i32) {
    %c0_i32 = arith.constant 0 : i32
    %c0_i32_0 = arith.constant 0 : i32
    %c0_i32_1 = arith.constant 0 : i32
    return %c0_i32, %c0_i32_0 : i32, i32
  }
  func.func @transform_7(%arg0: i32) -> (i32, i32) {
    %c0_i32 = arith.constant 0 : i32
    %c0_i32_0 = arith.constant 0 : i32
    %c0_i32_1 = arith.constant 0 : i32
    return %c0_i32, %c0_i32_0 : i32, i32
  }
  func.func @transform_8(%arg0: i32) -> (i32, i32) {
    %c0_i32 = arith.constant 0 : i32
    %c0_i32_0 = arith.constant 0 : i32
    %c0_i32_1 = arith.constant 0 : i32
    return %c0_i32, %c0_i32_0 : i32, i32
  }
  func.func @transform_9(%arg0: i32) -> (i32, i32) {
    %c0_i32 = arith.constant 0 : i32
    %c0_i32_0 = arith.constant 0 : i32
    %c0_i32_1 = arith.constant 0 : i32
    return %c0_i32, %c0_i32_0 : i32, i32
  }
  func.func @transform_10(%arg0: i32) -> (i32, i32) {
    %c0_i32 = arith.constant 0 : i32
    %c0_i32_0 = arith.constant 0 : i32
    %c0_i32_1 = arith.constant 0 : i32
    return %c0_i32, %c0_i32_0 : i32, i32
  }
  func.func @transform_11(%arg0: i32) -> (i32, i32) {
    %c0_i32 = arith.constant 0 : i32
    %c0_i32_0 = arith.constant 0 : i32
    %c0_i32_1 = arith.constant 0 : i32
    return %c0_i32, %c0_i32_0 : i32, i32
  }
  func.func @transform_12(%arg0: i32) -> (i32, i32) {
    %c0_i32 = arith.constant 0 : i32
    %c0_i32_0 = arith.constant 0 : i32
    %c0_i32_1 = arith.constant 0 : i32
    return %c0_i32, %c0_i32_0 : i32, i32
  }
  func.func @transform_13(%arg0: i32) -> (i32, i32) {
    %c0_i32 = arith.constant 0 : i32
    %c0_i32_0 = arith.constant 0 : i32
    %c0_i32_1 = arith.constant 0 : i32
    return %c0_i32, %c0_i32_0 : i32, i32
  }
  func.func @transform_14(%arg0: i32) -> (i32, i32) {
    %c0_i32 = arith.constant 0 : i32
    %c0_i32_0 = arith.constant 0 : i32
    %c0_i32_1 = arith.constant 0 : i32
    return %c0_i32, %c0_i32_0 : i32, i32
  }
}

</mosaic_0001>

<bundles_post_ra>
// kernel: bert_selfatt_layer.1
= control target key start
LH: loop header
LB: loop body
LE: loop exit
PB: predicated region body
PF: predicated region fallthrough
CT: control target
= control target key end

     0   :  { %19 = vsyncpa [#allocation3], 0  ;;  %s2958_s0 = inlined_call_operand.vmem [shape: f32[16,32], index: 0, kind: input, shape index: {}]   ;;  %s2959_s1 = inlined_call_operand.vmem [shape: f32[2,8], index: 1, kind: input, shape index: {}]   ;;  %s2960_s2 = inlined_call_operand.vmem [shape: f32[32,32], index: 2, kind: input, shape index: {}]   ;;  %s2961_s3 = inlined_call_operand.vmem [shape: f32[1,32], index: 3, kind: input, shape index: {}]   ;;  %s2962_s4 = inlined_call_operand.hbm [shape: f32[32,32], index: 4, kind: input, shape index: {}]   ;;  %s2963_s5 = inlined_call_operand.vmem [shape: f32[1,32], index: 5, kind: input, shape index: {}]   ;;  %s2964_s6 = inlined_call_operand.hbm [shape: f32[32,32], index: 6, kind: input, shape index: {}]   ;;  %s2965_s7 = inlined_call_operand.vmem [shape: f32[1,32], index: 7, kind: input, shape index: {}]   ;;  %s2966_s8 = inlined_call_operand.vmem [shape: f32[8,8], index: 8, kind: input, shape index: {}]   ;;  %s2967_s9 = inlined_call_operand.vmem [shape: f32[8,8], index: 9, kind: input, shape index: {}]   ;;  %s2968_s10 = inlined_call_operand.hbm [shape: f32[32,32], index: 10, kind: input, shape index: {}]   ;;  %s2969_s11 = inlined_call_operand.vmem [shape: f32[1,32], index: 11, kind: input, shape index: {}]   ;;  %s2970_s12 = inlined_call_operand.vmem [shape: f32[1,32], index: 12, kind: input, shape index: {}]   ;;  %s2971_s13 = inlined_call_operand.vmem [shape: f32[1,32], index: 13, kind: input, shape index: {}]   ;;  %s2972_s14 = inlined_call_operand.hbm [shape: f32[16,32], index: 14, kind: output, shape index: {}]  }
   0x1   :  { %20 = vsyncpa [#allocation6], 0 }
   0x2   :  { %21 = vsyncpa [#allocation4], 0  ;;  %s2556_s29 = smov [#allocation5]   ;;  %s2557_s15 = smov [#allocation2]  }
   0x3   :  { %s49_s30 = sshll.u32 %s2556_s29, 4  ;;  %s35_s16 = sshll.u32 %s2557_s15, 4  ;;  %s50_s30 = int_to_ptr.vmem [resolvable:$true] %s49_s30  ;;  %s2645_s16 = int_to_ptr.vmem [resolvable:$true] %s35_s16 }
   0x4   :  { %s2462_s19 = scalar_lea.hbm %s2964_s6, 512 }
   0x5   :  { %p2463_p0 = scmp.ne.s32.totalorder %s2964_s6, %s2462_s19  ;;  %p2466_p1 = scmp.lt.u32.totalorder %s2462_s19, %s2964_s6 }
   0x7   :  { %p2468_p2 = pnand %p2466_p1, %p2463_p0 }
   0x9   :  { %2471 = shalt.err (!%p2468_p2)
}
   0xa   :  { %s2472_s24 = scalar_lea.vmem %s50_s30, 512  ;;  %p2477_p4 = scmp.lt.s32.totalorder %s50_s30, %s50_s30 }
   0xb   :  { %p2473_p3 = scmp.ne.s32.totalorder %s50_s30, %s2472_s24  ;;  %p2478_p5 = scmp.lt.s32.totalorder %s2472_s24, %s2472_s24 }
   0xd   :  { %p2479_p6 = por %p2478_p5, %p2477_p4 }
   0xf   :  { %p2480_p7 = pnand %p2479_p6, %p2473_p3 }
  0x11   :  { %2483 = shalt.err (!%p2480_p7)
}
  0x12   :  { %s2558_s25 = smov 128   ;;  %s2559_s26 = smov 8  }
  0x13   :  { %55 = dma.hbm_to_vmem [thread:$0]  %s2964_s6, 512, %s50_s30, [#allocation6], %s2558_s25, %s2558_s25, %s2559_s26  }
  0x14   :  { %s2484_s17 = scalar_lea.hbm %s2962_s4, 512 }
  0x15   :  { %p2485_p8 = scmp.ne.s32.totalorder %s2962_s4, %s2484_s17  ;;  %p2488_p9 = scmp.lt.u32.totalorder %s2484_s17, %s2962_s4 }
  0x17   :  { %p2490_p10 = pnand %p2488_p9, %p2485_p8 }
  0x19   :  { %2493 = shalt.err (!%p2490_p10)
}
  0x1a   :  { %s2494_s22 = scalar_lea.vmem %s2645_s16, 512  ;;  %p2499_p12 = scmp.lt.s32.totalorder %s2645_s16, %s2645_s16 }
  0x1b   :  { %p2495_p11 = scmp.ne.s32.totalorder %s2645_s16, %s2494_s22  ;;  %p2500_p13 = scmp.lt.s32.totalorder %s2494_s22, %s2494_s22 }
  0x1d   :  { %p2501_p0 = por %p2500_p13, %p2499_p12 }
  0x1f   :  { %p2502_p1 = pnand %p2501_p0, %p2495_p11 }
  0x21   :  { %2505 = shalt.err (!%p2502_p1)
}
  0x22   :  { %41 = dma.hbm_to_vmem [thread:$0]  %s2962_s4, 512, %s2645_s16, [#allocation3], %s2558_s25, %s2558_s25, %s2559_s26  }
  0x23   :  { %s2560_s23 = smov [#allocation7]   ;;  %s2506_s29 = scalar_lea.hbm %s2968_s10, 512 }
  0x24   :  { %s67_s24 = sshll.u32 %s2560_s23, 4  ;;  %p2507_p2 = scmp.ne.s32.totalorder %s2968_s10, %s2506_s29  ;;  %s68_s24 = int_to_ptr.vmem [resolvable:$true] %s67_s24 }
  0x25   :  { %p2510_p3 = scmp.lt.u32.totalorder %s2506_s29, %s2968_s10 }
  0x27   :  { %p2512_p4 = pnand %p2510_p3, %p2507_p2 }
  0x29   :  { %2515 = shalt.err (!%p2512_p4)
}
  0x2a   :  { %s2516_s20 = scalar_lea.vmem %s68_s24, 512  ;;  %p2521_p6 = scmp.lt.s32.totalorder %s68_s24, %s68_s24 }
  0x2b   :  { %p2517_p5 = scmp.ne.s32.totalorder %s68_s24, %s2516_s20  ;;  %p2522_p7 = scmp.lt.s32.totalorder %s2516_s20, %s2516_s20 }
  0x2d   :  { %p2523_p8 = por %p2522_p7, %p2521_p6 }
  0x2f   :  { %p2524_p9 = pnand %p2523_p8, %p2517_p5 }
  0x31   :  { %2527 = shalt.err (!%p2524_p9)
}
  0x32   :  { %73 = dma.hbm_to_vmem [thread:$0]  %s2968_s10, 512, %s68_s24, [#allocation6], %s2558_s25, %s2558_s25, %s2559_s26  }
  0x33   :  { %2550 = dma.done.wait [#allocation3], 512  }
  0x34   :  { %2551 = vsyncadd [#allocation3], 4294966784 }
  0x35   :  { %2552 = dma.done.wait [#allocation6], 1024  }
  0x36   :  { %2553 = vsyncadd [#allocation6], 4294966272  ;;  %v186_v0 = vld [vmem:[#allocation2] sm:$0xff]  ;;  %v187_v1 = vld [vmem:[#allocation2 + $0x8] sm:$0xff]  ;;  %vm102_vm0 = vcmask 261120   ;;  %v2561_v15 = vmov 0.0   ;;  %v366_v38 = vlaneseq }
  0x37   :  { %v91_v2 = vld [vmem:[%s2960_s2] sm:$0xff]  ;;  %v2390_v3 = vpack.c.bf16 %v187_v1, %v186_v0  ;;  %v92_v4 = vld [vmem:[%s2960_s2 + $0x8] sm:$0xff]  ;;  %v188_v5 = vld [vmem:[#allocation2 + $0x10] sm:$0xff]  ;;  %vm2562_vm1 = vmmov 0   ;;  %vm400_vm2 = vcmask 64512   ;;  %s2567_s6 = smov 24  }
  0x38   :  { %v189_v6 = vld [vmem:[#allocation2 + $0x18] sm:$0xff]  ;;  %v2382_v7 = vpack.c.bf16 %v92_v4, %v91_v2  ;;  %v93_v9 = vld [vmem:[%s2960_s2 + $0x10] sm:$0xff]  ;;  %v2712_v11 = vld [vmem:[%s2958_s0] sm:$0xff]  ;;  %v2563_v36 = vmov 1966171168   ;;  %v367_v41 = vshrl.u32 %v366_v38, 7 }
  0x39   :  { %v2394_v8 = vpack.c.bf16 %v189_v6, %v188_v5  ;;  %v94_v10 = vld [vmem:[%s2960_s2 + $0x18] sm:$0xff]  ;;  %2391 = vmatprep.subr.bf16.mxu1 %v2390_v3  ;;  %2268 = vmatprep.mubr.msk.f32.mxu1 %vm102_vm0, %v2712_v11  ;;  %v2719_v13 = vld [vmem:[%s2966_s8] sm:$0xff]  ;;  %v2728_v14 = vld [vmem:[%s2958_s0 + $0x8] sm:$0xff]  ;;  %v364_v37 = vunpack.c.l.s4 %v2563_v36  ;;  %s2568_s30 = smov 104   ;;  %s2569_s29 = smov [#allocation8]  }
  0x3a   :  { %v2386_v12 = vpack.c.bf16 %v94_v10, %v93_v9  ;;  %2393 = vmatpush3.bf16.msra.mxu1 %v2390_v3  ;;  %2383 = vmatprep.subr.bf16.mxu0 %v2382_v7  ;;  %v2146_v16 = vld [vmem:[%s2963_s5] ss:$0 sm:$0xff]  ;;  %v273_v31 = vld [vmem:[#allocation5 + $0x8] sm:$0xff]  ;;  %v274_v32 = vld [vmem:[#allocation5 + $0x10] sm:$0xff]  ;;  %v387_v46 = vsub.s32 0, %v367_v41  ;;  %s2130_s15 = sshll.u32 %s2569_s29, 4  ;;  %s2131_s15 = int_to_ptr.vmem [resolvable:$true] %s2130_s15 }
  0x3b   :  { %2385 = vmatpush3.bf16.msra.mxu0 %v2382_v7  ;;  %2395 = vmatprep.subr.bf16.mxu1 %v2394_v8  ;;  %v2143_v18 = vld [vmem:[%s2961_s3] ss:$0 sm:$0xff]  ;;  %v275_v34 = vld [vmem:[#allocation5 + $0x18] sm:$0xff]  ;;  %v365_v40 = vunpack.c.0.s8 %v364_v37  ;;  %s2528_s17 = scalar_lea.vmem %s2131_s15, 256  ;;  %p2533_p11 = scmp.lt.s32.totalorder %s2131_s15, %s2131_s15 }
  0x3c   :  { %2387 = vmatprep.subr.bf16.mxu0 %v2386_v12  ;;  %2257 = vmatprep.mubr.msk.f32.mxu0 %vm102_vm0, %v2712_v11  ;;  %v272_v30 = vld [vmem:[#allocation5] sm:$0xff]  ;;  %v2402_v35 = vpack.c.bf16 %v275_v34, %v274_v32  ;;  %p2529_p10 = scmp.ne.s32.totalorder %s2131_s15, %s2528_s17  ;;  %p2534_p12 = scmp.lt.s32.totalorder %s2528_s17, %s2528_s17 }
  0x3d   :  { %723 = vrot.lane.b32.xlu1 %v2719_v13, %s2559_s26  ;;  %v2398_v33 = vpack.c.bf16 %v273_v31, %v272_v30  ;;  %v358_v39 = vld [vmem:[%s2959_s1] sm:$0x3]  ;;  %v368_v42 = vsub.s32 %v365_v40, %v367_v41  ;;  %s2564_s1 = smov 120  }
  0x3e   :  { %2397 = vmatpush3.bf16.msra.mxu1 %v2394_v8  ;;  %vm359_vm3 = vcmp.lt.f32.partialorder %v358_v39, 0.5  ;;  %v361_v50 = vld [vmem:[%s2967_s9] sm:$0xff]  ;;  %s2565_s9 = smov 16   ;;  %p2535_p13 = por %p2534_p12, %p2533_p11 }
  0x3f   :  { %2389 = vmatpush3.bf16.msra.mxu0 %v2386_v12  ;;  %2282 = vmatprep.subr.mxu1 %v2561_v15  ;;  %v360_v43 = vsel %vm359_vm3, -1e+09, %v2561_v15  ;;  %v2149_v12 = vld [vmem:[%s2965_s7] ss:$0 sm:$0xff]  ;;  %s2566_s7 = smov 112  }
  0x40   :  { %2399 = vmatprep.subr.bf16.mxu0 %v2398_v33  ;;  %v369_v44 = vrot.slane %v360_v43, %v368_v42  ;;  %p2536_p0 = pnand %p2535_p13, %p2529_p10 }
  0x41   :  { %2269 = vmatmul.mubr.msk.f32.vlgmr.msra.gmra.mrb[0].mxu1 %vm102_vm0, %v2728_v14 }
  0x42   :  { %2258 = vmatmul.mubr.msk.f32.vlgmr.msra.gmra.mrb[0].mxu0 %vm102_vm0, %v2728_v14  ;;  %2284 = vmatprep.mubr.msk.f32.mxu1 %vm2562_vm1, %v2561_v15  ;;  %v377_v45 = vrot.slane %v369_v44, %v368_v42  ;;  %v370_v47 = vcombine.high %v369_v44, %v369_v44 }
  0x43   :  { %2279 = vmatprep.mubr.msk.f32.mxu0 %vm102_vm0, %v2712_v11  ;;  %2401 = vmatpush3.bf16.msra.mxu0 %v2398_v33 }
  0x44   :  { %2403 = vmatprep.subr.bf16.mxu0 %v2402_v35  ;;  %v388_v48 = vrot.slane %v377_v45, %v387_v46  ;;  %v384_v49 = vrot.slane %v370_v47, %v368_v42 }
  0x46   :  { %v2781_v51 = vadd.f32 %v388_v48, %v361_v50  ;;  %v392_v52 = vrot.slane %v384_v49, %v387_v46 }
  0x47   :  { %2405 = vmatpush3.bf16.msra.mxu0 %v2402_v35 }
  0x48   :  { %2302 = vmatprep.subr.mxu0 %v2561_v15  ;;  %v2784_v56 = vadd.f32 %v392_v52, %v361_v50 }
  0x4a   :  { %2280 = vmatmul.mubr.msk.f32.vlgmr.msra.gmra.mrb[2].mxu0 %vm102_vm0, %v2728_v14 }
  0x4b   :  { %2304 = vmatprep.mubr.msk.f32.mxu0 %vm2562_vm1, %v2561_v15 }
  0xaf   :  { %v724_v62 = vpop.permute.xlu1 %723 }
 0x114   :  { %v2270_v17 = vpop.f32.mrb[0].mxu1 }
 0x115   :  { %v263_v19 = vpop.f32.mrb[1].mxu1  ;;  %v2259_v20 = vpop.f32.mrb[0].mxu0  ;;  %v2747_v24 = vadd.f32 %v2270_v17, %v2146_v16 }
 0x116   :  { %v2745_v21 = vadd.f32 %v2146_v16, %v263_v19  ;;  %v175_v22 = vpop.f32.mrb[1].mxu0  ;;  %v181_v27 = vadd.f32 %v2259_v20, %v2143_v18 }
 0x117   :  { %v176_v23 = vadd.f32 %v2143_v18, %v175_v22  ;;  %v399_v28 = vadd.f32 %v2719_v13, %v2747_v24  ;;  %v727_v63 = vadd.f32 %v724_v62, %v2747_v24 }
 0x118   :  { %v398_v25 = vadd.f32 %v2719_v13, %v2745_v21  ;;  %v2762_v29 = vmul.f32 0.35355338, %v181_v27  ;;  %v726_v19 = vadd.f32 %v724_v62, %v2745_v21 }
 0x119   :  { %v2751_v26 = vmul.f32 0.35355338, %v176_v23 }
 0x11a   :  { %2283 = vmatpush3.xpose.msk.msra.mxu1 %vm400_vm2, %v398_v25 }
 0x11b   :  { %2287 = vmatprep.subr.mxu1 %v2561_v15 }
 0x11d   :  { %2285 = vmatmul.mubr.msk.f32.vlgmr.msra.gmra.mrb[2].mxu1 %vm400_vm2, %v2751_v26  ;;  %v2281_v10 = vpop.f32.mrb[2].mxu0 }
 0x11e   :  { %2288 = vmatpush3.xpose.msk.msra.mxu1 %vm400_vm2, %v399_v28  ;;  %2289 = vmatprep.mubr.msk.f32.mxu1 %vm2562_vm1, %v2561_v15  ;;  %v349_v16 = vpop.f32.mrb[3].mxu0  ;;  %v2799_v17 = vadd.f32 %v2281_v10, %v2149_v12  ;;  %v721_v10 = vld [vmem:[#allocation7] sm:$0xff] }
 0x11f   :  { %2292 = vmatprep.subr.mxu1 %v2561_v15  ;;  %v2801_v18 = vadd.f32 %v2149_v12, %v349_v16 }
 0x121   :  { %2290 = vmatmul.mubr.msk.f32.vlgmr.msra.gmra.mrb[4].mxu1 %vm400_vm2, %v2762_v29 }
 0x122   :  { %2294 = vmatprep.mubr.msk.f32.mxu1 %vm2562_vm1, %v2561_v15  ;;  %2293 = vmatpush3.msra.mxu1 %v2801_v18 }
 0x123   :  { %2297 = vmatprep.subr.mxu1 %v2561_v15 }
 0x1f0   :  { %v473_v53 = vpop.f32.mrb[2].mxu1 }
 0x1f1   :  { %v474_v54 = vadd.f32 %v473_v53, %v2781_v51  ;;  %v2286_v55 = vpop.f32.mrb[3].mxu1 }
 0x1f3   :  { %v553_v57 = vsel %vm400_vm2, %v474_v54, -inf }
 0x1f4   :  { %554 = vmax.xlane.f32.xlu0 %v553_v57  ;;  %v549_v58 = vpop.f32.mrb[4].mxu1 }
 0x1f5   :  { %v550_v59 = vadd.f32 %v549_v58, %v2784_v56  ;;  %v2291_v60 = vpop.f32.mrb[5].mxu1 }
 0x1f7   :  { %v556_v61 = vsel %vm400_vm2, %v550_v59, -inf }
 0x1f8   :  { %557 = vmax.xlane.f32.xlu0 %v556_v61 }
 0x20e   :  { %810 = vrot.lane.b32.xlu0 %v727_v63, %s2564_s1 }
 0x281   :  { %v555_v0 = vpop.xlane.xlu0 %554 }
 0x282   :  { %v559_v1 = vsub.f32 %v474_v54, %v555_v0 }
 0x284   :  { %v561_v2 = vmul.f32 1.442695, %v559_v1 }
 0x285   :  { %v558_v3 = vpop.xlane.xlu0 %557 }
 0x286   :  { %2426 = vpow2.f32 %v561_v2  ;;  %v560_v4 = vsub.f32 %v550_v59, %v558_v3 }
 0x288   :  { %v563_v5 = vmul.f32 1.442695, %v560_v4 }
 0x289   :  { %v811_v20 = vpop.permute.xlu0 %810 }
 0x28a   :  { %2428 = vpow2.f32 %v563_v5 }
 0x290   :  { %v2427_v6 = vpop.eup %2426 }
 0x291   :  { %v565_v7 = vsel %vm400_vm2, %v2427_v6, 0.0 }
 0x292   :  { %566 = vadd.xlane.f32.xlu1 %v565_v7 }
 0x294   :  { %v2429_v8 = vpop.eup %2428 }
 0x295   :  { %v568_v9 = vsel %vm400_vm2, %v2429_v8, 0.0 }
 0x296   :  { %569 = vadd.xlane.f32.xlu0 %v568_v9  ;;  %v1062_v9 = vld [vmem:[#allocation7 + $0x8] sm:$0xff] }
 0x2a3   :  { %728 = vrot.lane.b32.xlu1 %v2751_v26, %s2564_s1 }
 0x2a7   :  { %1225 = vrot.lane.b32.xlu1 %v2719_v13, %s2565_s9 }
 0x2ac   :  { %807 = vrot.lane.b32.xlu0 %v2762_v29, %s2564_s1 }
 0x2b0   :  { %731 = vrot.lane.b32.xlu0 %v726_v19, %s2564_s1 }
 0x31f   :  { %v567_v22 = vpop.xlane.xlu1 %566 }
 0x320   :  { %2430 = vrcp.f32 %v567_v22 }
 0x323   :  { %v570_v23 = vpop.xlane.xlu0 %569  ;;  %v729_v32 = vpop.permute.xlu1 %728 }
 0x324   :  { %2432 = vrcp.f32 %v570_v23 }
 0x327   :  { %v808_v25 = vpop.permute.xlu0 %807  ;;  %v1226_v44 = vpop.permute.xlu1 %1225 }
 0x328   :  { %v1228_v45 = vadd.f32 %v1226_v44, %v2745_v21  ;;  %v1229_v46 = vadd.f32 %v1226_v44, %v2747_v24 }
 0x32a   :  { %v2431_v27 = vpop.eup %2430 }
 0x32b   :  { %v573_v28 = vmul.f32 %v2431_v27, %v2427_v6  ;;  %v732_v30 = vpop.permute.xlu0 %731 }
 0x32c   :  { %2303 = vmatpush3.xpose.msk.msra.mxu0 %vm400_vm2, %v732_v30 }
 0x32d   :  { %2295 = vmatmul.mubr.msk.f32.vlgmr.msra.gmra.mrb[6].mxu1 %vm400_vm2, %v573_v28  ;;  %2312 = vmatprep.subr.mxu0 %v2561_v15 }
 0x32e   :  { %v2433_v31 = vpop.eup %2432  ;;  %2298 = vmatpush3.msra.mxu1 %v2799_v17  ;;  %2299 = vmatprep.mubr.msk.f32.mxu1 %vm2562_vm1, %v2561_v15 }
 0x32f   :  { %v574_v33 = vmul.f32 %v2433_v31, %v2429_v8  ;;  %2305 = vmatmul.mubr.msk.f32.vlgmr.msra.gmra.mrb[4].mxu0 %vm400_vm2, %v729_v32  ;;  %2307 = vmatprep.subr.mxu1 %v2561_v15 }
 0x330   :  { %2314 = vmatprep.mubr.msk.f32.mxu0 %vm2562_vm1, %v2561_v15 }
 0x331   :  { %2300 = vmatmul.mubr.msk.f32.vlgmr.msra.gmra.mrb[8].mxu1 %vm400_vm2, %v574_v33 }
 0x332   :  { %2309 = vmatprep.mubr.msk.f32.mxu1 %vm2562_vm1, %v2561_v15 }
 0x335   :  { %2308 = vmatpush3.xpose.msk.msra.mxu1 %vm400_vm2, %v811_v20 }
 0x336   :  { %2317 = vmatprep.subr.mxu1 %v2561_v15 }
 0x338   :  { %2310 = vmatmul.mubr.msk.f32.vlgmr.msra.gmra.mrb[10].mxu1 %vm400_vm2, %v808_v25 }
 0x339   :  { %2319 = vmatprep.mubr.msk.f32.mxu1 %vm2562_vm1, %v2561_v15 }
 0x400   :  { %v2827_v34 = vpop.f32.mrb[6].mxu1 }
 0x401   :  { %v2296_v35 = vpop.f32.mrb[7].mxu1 }
 0x402   :  { %v803_v36 = vpop.f32.mrb[4].mxu0 }
 0x403   :  { %v2306_v37 = vpop.f32.mrb[5].mxu0  ;;  %v804_v47 = vadd.f32 %v803_v36, %v2781_v51 }
 0x404   :  { %v2829_v38 = vpop.f32.mrb[8].mxu1 }
 0x405   :  { %v2301_v39 = vpop.f32.mrb[9].mxu1  ;;  %v886_v48 = vsel %vm400_vm2, %v804_v47, -inf }
 0x40b   :  { %v882_v40 = vpop.f32.mrb[10].mxu1 }
 0x40c   :  { %v883_v41 = vadd.f32 %v882_v40, %v2784_v56  ;;  %v2311_v42 = vpop.f32.mrb[11].mxu1 }
 0x40e   :  { %v889_v43 = vsel %vm400_vm2, %v883_v41, -inf }
 0x40f   :  { %890 = vmax.xlane.f32.xlu0 %v889_v43 }
 0x425   :  { %986 = vrot.lane.b32.xlu0 %v2799_v17, %s2564_s1 }
 0x429   :  { %1233 = vrot.lane.b32.xlu0 %v1228_v45, %s2566_s7 }
 0x42d   :  { %1312 = vrot.lane.b32.xlu0 %v1229_v46, %s2566_s7 }
 0x431   :  { %1309 = vrot.lane.b32.xlu0 %v2762_v29, %s2566_s7 }
 0x450   :  { %887 = vmax.xlane.f32.xlu0 %v886_v48 }
 0x466   :  { %909 = vrot.lane.b32.xlu0 %v2801_v18, %s2564_s1 }
 0x49c   :  { %v891_v49 = vpop.xlane.xlu0 %890 }
 0x49d   :  { %v893_v50 = vsub.f32 %v883_v41, %v891_v49 }
 0x49f   :  { %v896_v52 = vmul.f32 1.442695, %v893_v50 }
 0x4a0   :  { %v987_v53 = vpop.permute.xlu0 %986 }
 0x4a1   :  { %2434 = vpow2.f32 %v896_v52  ;;  %2318 = vmatpush3.msra.mxu1 %v987_v53 }
 0x4a2   :  { %2332 = vmatprep.subr.mxu1 %v2561_v15 }
 0x4a4   :  { %v1234_v57 = vpop.permute.xlu0 %1233 }
 0x4a8   :  { %v1313_v58 = vpop.permute.xlu0 %1312 }
 0x4ab   :  { %v2435_v54 = vpop.eup %2434 }
 0x4ac   :  { %v901_v55 = vsel %vm400_vm2, %v2435_v54, 0.0  ;;  %v1310_v59 = vpop.permute.xlu0 %1309 }
 0x4ad   :  { %902 = vadd.xlane.f32.xlu1 %v901_v55 }
 0x4be   :  { %1230 = vrot.lane.b32.xlu1 %v2751_v26, %s2566_s7 }
 0x4dd   :  { %v888_v60 = vpop.xlane.xlu0 %887 }
 0x4de   :  { %v892_v61 = vsub.f32 %v804_v47, %v888_v60  ;;  %v1562_v47 = vld [vmem:[#allocation7 + $0x10] sm:$0xff] }
 0x4e0   :  { %v894_v62 = vmul.f32 1.442695, %v892_v61 }
 0x4e1   :  { %v910_v63 = vpop.permute.xlu0 %909 }
 0x4e2   :  { %2436 = vpow2.f32 %v894_v62  ;;  %2313 = vmatpush3.msra.mxu0 %v910_v63 }
 0x4e3   :  { %2322 = vmatprep.subr.mxu0 %v1062_v9 }
 0x4ec   :  { %v2437_v0 = vpop.eup %2436 }
 0x4ed   :  { %v898_v1 = vsel %vm400_vm2, %v2437_v0, 0.0 }
 0x4ee   :  { %899 = vadd.xlane.f32.xlu1 %v898_v1 }
 0x53a   :  { %v903_v2 = vpop.xlane.xlu1 %902 }
 0x53b   :  { %2438 = vrcp.f32 %v903_v2 }
 0x53e   :  { %v1231_v5 = vpop.permute.xlu1 %1230 }
 0x545   :  { %v2439_v3 = vpop.eup %2438 }
 0x546   :  { %v907_v4 = vmul.f32 %v2439_v3, %v2435_v54 }
 0x548   :  { %2320 = vmatmul.mubr.msk.f32.vlgmr.msra.gmra.mrb[12].mxu1 %vm400_vm2, %v907_v4 }
 0x549   :  { %2333 = vmatpush3.xpose.msk.msra.mxu1 %vm400_vm2, %v1234_v57  ;;  %2334 = vmatprep.mubr.msk.f32.mxu1 %vm2562_vm1, %v2561_v15 }
 0x54a   :  { %2337 = vmatprep.subr.mxu1 %v2561_v15 }
 0x54c   :  { %2335 = vmatmul.mubr.msk.f32.vlgmr.msra.gmra.mrb[14].mxu1 %vm400_vm2, %v1231_v5 }
 0x54d   :  { %2338 = vmatpush3.xpose.msk.msra.mxu1 %vm400_vm2, %v1313_v58  ;;  %2339 = vmatprep.mubr.msk.f32.mxu1 %vm2562_vm1, %v2561_v15 }
 0x54e   :  { %2347 = vmatprep.subr.mxu1 %v2561_v15 }
 0x550   :  { %2340 = vmatmul.mubr.msk.f32.vlgmr.msra.gmra.mrb[16].mxu1 %vm400_vm2, %v1310_v59 }
 0x551   :  { %2349 = vmatprep.mubr.msk.f32.mxu1 %vm2562_vm1, %v2561_v15 }
 0x57b   :  { %v900_v6 = vpop.xlane.xlu1 %899 }
 0x57c   :  { %2440 = vrcp.f32 %v900_v6 }
 0x586   :  { %v2441_v7 = vpop.eup %2440 }
 0x587   :  { %v906_v8 = vmul.f32 %v2441_v7, %v2437_v0 }
 0x589   :  { %2315 = vmatmul.mubr.msk.f32.vlgmr.msra.gmra.mrb[6].mxu0 %vm400_vm2, %v906_v8 }
 0x58a   :  { %2323 = vmatpush3.msra.mxu0 %v1062_v9 }
 0x58b   :  { %2327 = vmatprep.subr.mxu0 %v721_v10 }
 0x61b   :  { %v1058_v12 = vpop.f32.mrb[12].mxu1 }
 0x61c   :  { %v2321_v16 = vpop.f32.mrb[13].mxu1 }
 0x61f   :  { %v1305_v19 = vpop.f32.mrb[14].mxu1 }
 0x620   :  { %v1306_v20 = vadd.f32 %v1305_v19, %v2781_v51  ;;  %v2336_v22 = vpop.f32.mrb[15].mxu1 }
 0x622   :  { %v1388_v23 = vsel %vm400_vm2, %v1306_v20, -inf }
 0x623   :  { %1389 = vmax.xlane.f32.xlu1 %v1388_v23  ;;  %v1384_v25 = vpop.f32.mrb[16].mxu1 }
 0x624   :  { %v1385_v27 = vadd.f32 %v1384_v25, %v2784_v56  ;;  %v2341_v28 = vpop.f32.mrb[17].mxu1 }
 0x626   :  { %v1391_v30 = vsel %vm400_vm2, %v1385_v27, -inf }
 0x627   :  { %1392 = vmax.xlane.f32.xlu1 %v1391_v30 }
 0x65c   :  { %v981_v31 = vpop.f32.mrb[6].mxu0 }
 0x65d   :  { %v2316_v32 = vpop.f32.mrb[7].mxu0  ;;  %2324 = vmatprep.mubr.msk.f32.mxu0 %vm400_vm2, %v981_v31 }
 0x65e   :  { %2325 = vmatmul.mubr.msk.f32.vlgmr.msra.gmra.mrb[8].mxu0 %vm400_vm2, %v1058_v12  ;;  %v2184_v32 = vld [vmem:[%s2969_s11] ss:$0 sm:$0xff] }
 0x65f   :  { %2329 = vmatprep.mubr.msk.f32.mxu0 %vm400_vm2, %v2827_v34  ;;  %2328 = vmatpush3.msra.mxu0 %v721_v10 }
 0x660   :  { %2342 = vmatprep.subr.mxu0 %v2561_v15 }
 0x666   :  { %2330 = vmatmul.mubr.msk.f32.vlgmr.msra.gmra.mrb[8].mxu0 %vm400_vm2, %v2829_v38 }
 0x667   :  { %2344 = vmatprep.mubr.msk.f32.mxu0 %vm2562_vm1, %v2561_v15 }
 0x6b0   :  { %v1390_v33 = vpop.xlane.xlu1 %1389 }
 0x6b1   :  { %v1394_v35 = vsub.f32 %v1306_v20, %v1390_v33 }
 0x6b3   :  { %v1396_v36 = vmul.f32 1.442695, %v1394_v35 }
 0x6b4   :  { %v1393_v37 = vpop.xlane.xlu1 %1392 }
 0x6b5   :  { %2442 = vpow2.f32 %v1396_v36  ;;  %v1395_v39 = vsub.f32 %v1385_v27, %v1393_v37  ;;  %v1983_v27 = vld [vmem:[#allocation7 + $0x18] sm:$0xff] }
 0x6b7   :  { %v1398_v40 = vmul.f32 1.442695, %v1395_v39 }
 0x6b9   :  { %2444 = vpow2.f32 %v1398_v40 }
 0x6bf   :  { %v2443_v41 = vpop.eup %2442 }
 0x6c0   :  { %v1400_v34 = vsel %vm400_vm2, %v2443_v41, 0.0 }
 0x6c1   :  { %1401 = vadd.xlane.f32.xlu1 %v1400_v34 }
 0x6c3   :  { %v2445_v42 = vpop.eup %2444 }
 0x6c4   :  { %v1403_v43 = vsel %vm400_vm2, %v2445_v42, 0.0 }
 0x6c5   :  { %1404 = vadd.xlane.f32.xlu0 %v1403_v43 }
 0x6d2   :  { %1410 = vrot.lane.b32.xlu1 %v2801_v18, %s2566_s7 }
 0x6d6   :  { %1486 = vrot.lane.b32.xlu1 %v2799_v17, %s2566_s7 }
 0x6da   :  { %1646 = vrot.lane.b32.xlu1 %v2719_v13, %s2567_s6 }
 0x74e   :  { %v1402_v38 = vpop.xlane.xlu1 %1401 }
 0x74f   :  { %2446 = vrcp.f32 %v1402_v38 }
 0x752   :  { %v1405_v44 = vpop.xlane.xlu0 %1404  ;;  %v1411_v45 = vpop.permute.xlu1 %1410 }
 0x753   :  { %2448 = vrcp.f32 %v1405_v44  ;;  %2343 = vmatpush3.msra.mxu0 %v1411_v45 }
 0x754   :  { %2352 = vmatprep.subr.mxu0 %v1562_v47 }
 0x756   :  { %v1487_v46 = vpop.permute.xlu1 %1486 }
 0x757   :  { %2348 = vmatpush3.msra.mxu1 %v1487_v46 }
 0x758   :  { %2357 = vmatprep.subr.mxu1 %v2561_v15 }
 0x759   :  { %v2447_v48 = vpop.eup %2446 }
 0x75a   :  { %v1408_v49 = vmul.f32 %v2447_v48, %v2443_v41  ;;  %v1647_v50 = vpop.permute.xlu1 %1646 }
 0x75b   :  { %v1649_v52 = vadd.f32 %v1647_v50, %v2745_v21  ;;  %v1650_v53 = vadd.f32 %v1647_v50, %v2747_v24 }
 0x75c   :  { %2345 = vmatmul.mubr.msk.f32.vlgmr.msra.gmra.mrb[10].mxu0 %vm400_vm2, %v1408_v49 }
 0x75d   :  { %v2449_v13 = vpop.eup %2448  ;;  %1733 = vrot.lane.b32.xlu0 %v1650_v53, %s2568_s30  ;;  %1654 = vrot.lane.b32.xlu1 %v1649_v52, %s2568_s30 }
 0x75e   :  { %v1409_v54 = vmul.f32 %v2449_v13, %v2445_v42  ;;  %2353 = vmatpush3.msra.mxu0 %v1562_v47 }
 0x75f   :  { %2362 = vmatprep.subr.mxu0 %v2561_v15 }
 0x760   :  { %2350 = vmatmul.mubr.msk.f32.vlgmr.msra.gmra.mrb[18].mxu1 %vm400_vm2, %v1409_v54 }
 0x761   :  { %1651 = vrot.lane.b32.xlu1 %v2751_v26, %s2568_s30  ;;  %2359 = vmatprep.mubr.msk.f32.mxu1 %vm2562_vm1, %v2561_v15 }
 0x765   :  { %1730 = vrot.lane.b32.xlu1 %v2762_v29, %s2568_s30 }
 0x7cf   :  { %v1655_v21 = vpop.permute.xlu1 %1654  ;;  %v1734_v58 = vpop.permute.xlu0 %1733 }
 0x7d0   :  { %2358 = vmatpush3.xpose.msk.msra.mxu1 %vm400_vm2, %v1655_v21 }
 0x7d1   :  { %2367 = vmatprep.subr.mxu1 %v2561_v15 }
 0x7d3   :  { %v1652_v24 = vpop.permute.xlu1 %1651 }
 0x7d4   :  { %2360 = vmatmul.mubr.msk.f32.vlgmr.msra.gmra.mrb[20].mxu1 %vm400_vm2, %v1652_v24  ;;  %v2185_v24 = vld [vmem:[%s2970_s12] ss:$0 sm:$0xff] }
 0x7d5   :  { %2369 = vmatprep.mubr.msk.f32.mxu1 %vm2562_vm1, %v2561_v15 }
 0x7d7   :  { %v1731_v29 = vpop.permute.xlu1 %1730 }
 0x82f   :  { %v1482_v55 = vpop.f32.mrb[10].mxu0 }
 0x830   :  { %v2346_v57 = vpop.f32.mrb[11].mxu0  ;;  %2354 = vmatprep.mubr.msk.f32.mxu0 %vm400_vm2, %v1482_v55 }
 0x833   :  { %v1558_v26 = vpop.f32.mrb[18].mxu1 }
 0x834   :  { %v2351_v59 = vpop.f32.mrb[19].mxu1  ;;  %2355 = vmatmul.mubr.msk.f32.vlgmr.msra.gmra.mrb[8].mxu0 %vm400_vm2, %v1558_v26 }
 0x835   :  { %2363 = vmatpush3.xpose.msk.msra.mxu0 %vm400_vm2, %v1734_v58  ;;  %2364 = vmatprep.mubr.msk.f32.mxu0 %vm2562_vm1, %v2561_v15  ;;  %v2186_v58 = vld [vmem:[%s2971_s13] ss:$0 sm:$0xff] }
 0x836   :  { %2372 = vmatprep.subr.mxu0 %v2561_v15 }
 0x838   :  { %2365 = vmatmul.mubr.msk.f32.vlgmr.msra.gmra.mrb[12].mxu0 %vm400_vm2, %v1731_v29 }
 0x839   :  { %2374 = vmatprep.mubr.msk.f32.mxu0 %vm2562_vm1, %v2561_v15 }
 0x8a7   :  { %v1726_v60 = vpop.f32.mrb[20].mxu1 }
 0x8a8   :  { %v1727_v61 = vadd.f32 %v1726_v60, %v2781_v51  ;;  %v2361_v62 = vpop.f32.mrb[21].mxu1 }
 0x8aa   :  { %v1809_v63 = vsel %vm400_vm2, %v1727_v61, -inf }
 0x8ab   :  { %1810 = vmax.xlane.f32.xlu1 %v1809_v63 }
 0x90b   :  { %v1805_v0 = vpop.f32.mrb[12].mxu0 }
 0x90c   :  { %v1806_v1 = vadd.f32 %v1805_v0, %v2784_v56  ;;  %v2366_v2 = vpop.f32.mrb[13].mxu0 }
 0x90e   :  { %v1812_v3 = vsel %vm400_vm2, %v1806_v1, -inf }
 0x90f   :  { %1813 = vmax.xlane.f32.xlu0 %v1812_v3 }
 0x925   :  { %1907 = vrot.lane.b32.xlu0 %v2799_v17, %s2568_s30 }
 0x938   :  { %v1811_v4 = vpop.xlane.xlu1 %1810 }
 0x939   :  { %v1815_v5 = vsub.f32 %v1727_v61, %v1811_v4 }
 0x93b   :  { %v1817_v15 = vmul.f32 1.442695, %v1815_v5 }
 0x93d   :  { %2450 = vpow2.f32 %v1817_v15 }
 0x947   :  { %v2451_v6 = vpop.eup %2450 }
 0x948   :  { %v1821_v51 = vsel %vm400_vm2, %v2451_v6, 0.0 }
 0x949   :  { %1822 = vadd.xlane.f32.xlu1 %v1821_v51 }
 0x99c   :  { %v1814_v7 = vpop.xlane.xlu0 %1813 }
 0x99d   :  { %v1816_v8 = vsub.f32 %v1806_v1, %v1814_v7 }
 0x99f   :  { %v1819_v9 = vmul.f32 1.442695, %v1816_v8 }
 0x9a0   :  { %v1908_v10 = vpop.permute.xlu0 %1907 }
 0x9a1   :  { %2452 = vpow2.f32 %v1819_v9  ;;  %2373 = vmatpush3.msra.mxu0 %v1908_v10 }
 0x9a2   :  { %2377 = vmatprep.subr.mxu0 %v1983_v27 }
 0x9ab   :  { %v2453_v56 = vpop.eup %2452 }
 0x9ac   :  { %v1824_v12 = vsel %vm400_vm2, %v2453_v56, 0.0 }
 0x9ad   :  { %1825 = vadd.xlane.f32.xlu1 %v1824_v12 }
 0x9be   :  { %1831 = vrot.lane.b32.xlu1 %v2801_v18, %s2568_s30 }
 0x9d6   :  { %v1823_v17 = vpop.xlane.xlu1 %1822 }
 0x9d7   :  { %2454 = vrcp.f32 %v1823_v17 }
 0x9e1   :  { %v2455_v19 = vpop.eup %2454 }
 0x9e2   :  { %v1829_v20 = vmul.f32 %v2455_v19, %v2451_v6 }
 0xa3a   :  { %v1826_v16 = vpop.xlane.xlu1 %1825 }
 0xa3b   :  { %2456 = vrcp.f32 %v1826_v16 }
 0xa3e   :  { %v1832_v22 = vpop.permute.xlu1 %1831 }
 0xa3f   :  { %2368 = vmatpush3.msra.mxu1 %v1832_v22 }
 0xa40   :  { %2370 = vmatmul.mubr.msk.f32.vlgmr.msra.gmra.mrb[22].mxu1 %vm400_vm2, %v1829_v20 }
 0xa45   :  { %v2457_v23 = vpop.eup %2456 }
 0xa46   :  { %v1830_v25 = vmul.f32 %v2457_v23, %v2453_v56 }
 0xa48   :  { %2375 = vmatmul.mubr.msk.f32.vlgmr.msra.gmra.mrb[14].mxu0 %vm400_vm2, %v1830_v25 }
 0xa49   :  { %2378 = vmatpush3.msra.mxu0 %v1983_v27 }
 0xb13   :  { %v1903_v28 = vpop.f32.mrb[22].mxu1 }
 0xb14   :  { %v2371_v30 = vpop.f32.mrb[23].mxu1  ;;  %2379 = vmatprep.mubr.msk.f32.mxu0 %vm400_vm2, %v1903_v28 }
 0xb1b   :  { %v1979_v18 = vpop.f32.mrb[14].mxu0 }
 0xb1c   :  { %v2376_v31 = vpop.f32.mrb[15].mxu0  ;;  %2380 = vmatmul.mubr.msk.f32.vlgmr.msra.gmra.mrb[8].mxu0 %vm400_vm2, %v1979_v18 }
 0xbef   :  { %v2381_v33 = vpop.f32.mrb[8].mxu0 }
 0xbf0   :  { %v2075_v35 = vadd.f32 %v2381_v33, %v2184_v32  ;;  %v2056_v36 = vpop.f32.mrb[9].mxu0 }
 0xbf1   :  { %v2074_v37 = vadd.f32 %v2184_v32, %v2056_v36 }
 0xbf2   :  { %v2077_v39 = vadd.f32 %v2075_v35, %v2728_v14 }
 0xbf3   :  { %v2076_v40 = vadd.f32 %v2074_v37, %v2712_v11 }
 0xbf4   :  { %v2081_v41 = vsel %vm102_vm0, %v2077_v39, 0.0 }
 0xbf5   :  { %2082 = vadd.xlane.f32.xlu0 %v2081_v41  ;;  %v2078_v34 = vsel %vm102_vm0, %v2076_v40, 0.0 }
 0xbf6   :  { %2079 = vadd.xlane.f32.xlu1 %v2078_v34 }
 0xc82   :  { %v2083_v42 = vpop.xlane.xlu0 %2082 }
 0xc83   :  { %v2086_v43 = vmul.f32 0.03125, %v2083_v42  ;;  %v2080_v38 = vpop.xlane.xlu1 %2079 }
 0xc84   :  { %v2085_v44 = vmul.f32 0.03125, %v2080_v38 }
 0xc85   :  { %v2088_v45 = vsub.f32 %v2077_v39, %v2086_v43 }
 0xc86   :  { %v2087_v46 = vsub.f32 %v2076_v40, %v2085_v44 }
 0xc87   :  { %v2090_v47 = vmul.f32 %v2088_v45, %v2088_v45 }
 0xc88   :  { %v2089_v48 = vmul.f32 %v2087_v46, %v2087_v46 }
 0xc89   :  { %v2094_v49 = vsel %vm102_vm0, %v2090_v47, 0.0 }
 0xc8a   :  { %2095 = vadd.xlane.f32.xlu0 %v2094_v49  ;;  %v2091_v14 = vsel %vm102_vm0, %v2089_v48, 0.0 }
 0xc8b   :  { %2092 = vadd.xlane.f32.xlu1 %v2091_v14 }
 0xd17   :  { %v2096_v11 = vpop.xlane.xlu0 %2095 }
 0xd18   :  { %v2098_v50 = vmul.f32 0.03125, %v2096_v11  ;;  %v2093_v52 = vpop.xlane.xlu1 %2092 }
 0xd19   :  { %v2097_v53 = vmul.f32 0.03125, %v2093_v52 }
 0xd1a   :  { %v2100_v13 = vadd.f32 1e-12, %v2098_v50 }
 0xd1b   :  { %v2099_v54 = vadd.f32 1e-12, %v2097_v53 }
 0xd1c   :  { %2458 = vrsqrt.f32 %v2100_v13 }
 0xd1d   :  { %2460 = vrsqrt.f32 %v2099_v54 }
 0xd26   :  { %v2459_v21 = vpop.eup %2458 }
 0xd27   :  { %v2461_v55 = vpop.eup %2460  ;;  %v2104_v57 = vmul.f32 %v2459_v21, %v2088_v45 }
 0xd28   :  { %v2103_v26 = vmul.f32 %v2461_v55, %v2087_v46 }
 0xd29   :  { %v2113_v59 = vmul.f32 %v2185_v24, %v2104_v57 }
 0xd2a   :  { %v2112_v29 = vmul.f32 %v2185_v24, %v2103_v26 }
 0xd2b   :  { %v2122_v60 = vadd.f32 %v2186_v58, %v2113_v59 }
 0xd2c   :  { %v2121_v61 = vadd.f32 %v2186_v58, %v2112_v29 }
 0xd2d   :  { %2124 = vst.msk [vmem:[#allocation8 + $0x8] sm:$0xff] %vm102_vm0, %v2122_v60 }
 0xd2e   :  { %2123 = vst.msk [vmem:[#allocation8] sm:$0xff] %vm102_vm0, %v2121_v61 }
 0xd2f   :  { %2539 = shalt.err (!%p2536_p0)
}
 0xd30   :  { %s2540_s2 = scalar_lea.hbm %s2972_s14, 256 }
 0xd31   :  { %p2541_p1 = scmp.ne.s32.totalorder %s2972_s14, %s2540_s2  ;;  %p2544_p2 = scmp.lt.u32.totalorder %s2540_s2, %s2972_s14 }
 0xd33   :  { %p2546_p3 = pnand %p2544_p2, %p2541_p1 }
 0xd35   :  { %2549 = shalt.err (!%p2546_p3)
}
 0xd36   :  { %2136 = dma.vmem_to_hbm [thread:$0]  %s2131_s15, 256, %s2972_s14, [#allocation4], %s2558_s25, %s2558_s25, %s2559_s26  }
 0xd37   :  { %2554 = dma.done.wait [#allocation4], 256  }
 0xd38   :  { %2555 = vsyncadd [#allocation4], 4294967040 }
 0xd39   :  { %2140 = vsyncpa [#allocation3], 1 }
 0xd3a   :  { %2141 = vsyncpa [#allocation6], 1 }
 0xd3b   :  { %2142 = vsyncpa [#allocation4], 1 }

</bundles_post_ra>
